<compile_context>
chip_gen: v5e
topology: v5e:2x2
jax: 0.10.0
libtpu: 0.0.40
codegen_flags: <defaults>
</compile_context>

<pallas_src>
from functools import partial

import jax
import jax.numpy as jnp
import numpy as np
from jax.experimental import pallas as pl
from jax.experimental.pallas import tpu as pltpu


# ----------------------------- Pallas kernel ------------------------------- #
def relpos_kernel(q_ref, w_ref, o_ref):
    # q_ref : (1, H*W, 2*W*D)   [q | q-spatially-transposed], bf16
    # w_ref : (2*W*D, W*W*W)    folded (rel_to_abs + expand_dim) tables, bf16
    # o_ref : (1, H*W, W*W*W)   float32, lane-dense (last dim = W*W*W)
    o_ref[0] = jnp.dot(
        q_ref[0], w_ref[...], preferred_element_type=jnp.float32
    ).astype(o_ref.dtype)


# ------------------------------- Wrapper ------------------------------------ #
@partial(jax.jit, static_argnames=("fmap_size", "compute_dtype"))
def rel_pos_emb(q, rel_height, rel_width, fmap_size,
                compute_dtype=jnp.bfloat16):
    H, W = fmap_size
    assert H == W, "module only shape-checks for square feature maps"
    B, heads, seq, D = q.shape
    assert heads == H and seq == W * W

    # ---- query: straight + spatially transposed views, concat on K axis ----
    q5 = q.reshape(B, H, W, W, D)
    Qc = q5.reshape(B, H * W, W * D)                        # rows (h,m1), cols (n1,d)
    QcT = jnp.swapaxes(q5, 2, 3).reshape(B, H * W, W * D)   # q5[h,n1,m1,d] at (h,m1),(n1,d)
    Qcat = jnp.concatenate([Qc, QcT], axis=-1).astype(compute_dtype)  # (B, H*W, 2*W*D)

    # ---- fold rel_to_abs into the parameter tables (index remap only) ------
    #   RW_abs[n1, n2, d] = rel_width[n2 - n1 + W - 1, d]
    r_idx = jnp.arange(W)[None, :] - jnp.arange(W)[:, None] + (W - 1)  # (n1, n2)
    RW_abs = rel_width[r_idx]                                          # (W, W, D)
    RH_abs = rel_height[r_idx]                                         # (W, W, D), H == W
    eye = jnp.eye(W, dtype=jnp.float32)
    # Wmat[(y,d), (z,n2)] = RW_abs[y, n2, d] * delta(y, z)   (block diagonal)
    Wmat = jnp.einsum('yjd,yz->ydzj', RW_abs, eye).reshape(W * D, W * W)
    Hmat = jnp.einsum('xjd,xz->xdzj', RH_abs, eye).reshape(W * D, W * W)
    WHmat = jnp.concatenate([Wmat, Hmat], axis=0)            # (2*W*D, W*W)
    # Fold the expand_dim(m2) broadcast in too: tile columns W times so the
    # matmul output is already the expanded, lane-dense (W*W*W) block.
    WHE = jnp.tile(WHmat, (1, W)).astype(compute_dtype)      # (2*W*D, W*W*W)

    out_flat = pl.pallas_call(
        relpos_kernel,
        out_shape=jax.ShapeDtypeStruct((B, H * W, W * W * W), jnp.float32),
        grid_spec=pltpu.PrefetchScalarGridSpec(
            num_scalar_prefetch=0,
            grid=(B,),
            in_specs=[
                pl.BlockSpec((1, H * W, 2 * W * D), lambda b: (b, 0, 0)),
                # grid-invariant weight: same block every step -> fetched once
                pl.BlockSpec((2 * W * D, W * W * W), lambda b: (0, 0)),
            ],
            out_specs=pl.BlockSpec((1, H * W, W * W * W), lambda b: (b, 0, 0)),
        ),
        compiler_params=pltpu.CompilerParams(
            dimension_semantics=("parallel",)),
    )(Qcat, WHE)

    # Free reshape (same memory order): [(h,m1),(m2,n1,n2)] -> [h,(m1,m2),(n1,n2)]
    return out_flat.reshape(B, H, H * W, W * W).astype(q.dtype)


# --------------------- Pure-JAX reference (torch semantics) ----------------- #
def _rel_to_abs_ref(x):
    b, h, l, _ = x.shape
    x = jnp.concatenate([x, jnp.zeros((b, h, l, 1), x.dtype)], axis=3)
    flat_x = x.reshape(b, h, l * 2 * l)
    flat_x = jnp.concatenate([flat_x, jnp.zeros((b, h, l - 1), x.dtype)], axis=2)
    final_x = flat_x.reshape(b, h, l + 1, 2 * l - 1)
    return final_x[:, :, :l, l - 1:]


def _relative_logits_1d_ref(q, rel_k):
    b, heads, hh, ww, dim = q.shape
    logits = jnp.einsum('bhxyd,rd->bhxyr', q, rel_k)
    logits = logits.reshape(b, heads * hh, ww, 2 * ww - 1)
    logits = _rel_to_abs_ref(logits)
    logits = logits.reshape(b, heads, hh, ww, ww)
    logits = jnp.broadcast_to(logits[:, :, :, None, :, :],
                              (b, heads, hh, hh, ww, ww))
    return logits


def rel_pos_emb_ref(q, rel_height, rel_width, fmap_size):
    H, W = fmap_size
    B, heads, seq, D = q.shape
    q5 = q.reshape(B, H, W, W, D)
    rw = _relative_logits_1d_ref(q5, rel_width).reshape(B, H, H * W, W * W)
    qp = jnp.transpose(q5, (0, 1, 3, 2, 4))
    rh = _relative_logits_1d_ref(qp, rel_height).reshape(B, H, W * W, H * W)
    return rw + rh


# ---------------------------------- main ------------------------------------ #
if __name__ == "__main__":
    B = 2
    fmap = 8          # fmap_size -> (8, 8)
    D = 32            # dim_head
    H = W = fmap

    key = jax.random.PRNGKey(0)
    k_h, k_w, k_q = jax.random.split(key, 3)
    scale = D ** -0.5
    rel_height = jax.random.normal(k_h, (2 * H - 1, D), jnp.float32) * scale
    rel_width = jax.random.normal(k_w, (2 * W - 1, D), jnp.float32) * scale
    q = jax.random.normal(k_q, (B, H, W * W, D), jnp.float32)

    out = rel_pos_emb(q, rel_height, rel_width, (H, W))
    out = jax.block_until_ready(out)

    ref = rel_pos_emb_ref(q, rel_height, rel_width, (H, W))
    # bf16 MXU inputs (f32 accumulation / f32 output) -> 2e-2 tolerance.
    np.testing.assert_allclose(np.asarray(out), np.asarray(ref),
                               rtol=2e-2, atol=2e-2)
    assert out.shape == (B, H, H * W, W * W)
    print("KERNEL_OK")
</pallas_src>

<mosaic_0001>
module attributes {stable_mosaic.version = 11 : i64} {
  func.func @relpos_kernel(%arg0: i32, %arg1: memref<1x64x512xbf16, #tpu.memory_space<vmem>>, %arg2: memref<512x512xbf16, #tpu.memory_space<vmem>>, %arg3: memref<1x64x512xf32, #tpu.memory_space<vmem>>) attributes {dimension_semantics = [#tpu.dimension_semantics<parallel>], iteration_bounds = array<i64: 2>, scalar_prefetch = 0 : i64, scratch_operands = 0 : i64, tpu.core_type = #tpu.core_type<tc>, window_params = [{transform_indices = @transform_0, window_bounds = array<i64: 1, 64, 512>}, {pipeline_mode = #tpu.pipeline_mode<synchronous>, transform_indices = @transform_1, window_bounds = array<i64: 512, 512>}, {transform_indices = @transform_2, window_bounds = array<i64: 1, 64, 512>}]} {
    %c0 = arith.constant 0 : index
    %c0_0 = arith.constant 0 : index
    %c0_1 = arith.constant 0 : index
    %0 = vector.load %arg1[%c0, %c0_0, %c0_1] : memref<1x64x512xbf16, #tpu.memory_space<vmem>>, vector<1x64x512xbf16>
    %1 = vector.shape_cast %0 : vector<1x64x512xbf16> to vector<64x512xbf16>
    %c0_2 = arith.constant 0 : index
    %c0_3 = arith.constant 0 : index
    %2 = vector.load %arg2[%c0_2, %c0_3] : memref<512x512xbf16, #tpu.memory_space<vmem>>, vector<512x512xbf16>
    %cst = arith.constant dense<0.000000e+00> : vector<64x512xf32>
    %3 = tpu.matmul %1, %2, %cst {dimension_numbers = #tpu.dot_dimension_numbers<[1], [0], [0], [1], [0, 0, 1, 1], [], []>} : vector<64x512xbf16>, vector<512x512xbf16>, vector<64x512xf32> -> vector<64x512xf32>
    %c0_4 = arith.constant 0 : index
    %c0_5 = arith.constant 0 : index
    %c0_6 = arith.constant 0 : index
    %4 = vector.load %arg3[%c0_4, %c0_5, %c0_6] : memref<1x64x512xf32, #tpu.memory_space<vmem>>, vector<1x64x512xf32>
    %5 = vector.shape_cast %4 : vector<1x64x512xf32> to vector<64x512xf32>
    %6 = vector.shape_cast %3 : vector<64x512xf32> to vector<1x64x512xf32>
    tpu.vector_store %arg3[%c0_4, %c0_5, %c0_6], %6 {strides = array<i32>} : memref<1x64x512xf32, #tpu.memory_space<vmem>>, vector<1x64x512xf32>,
    return
  }
  func.func @transform_0(%arg0: i32) -> (i32, i32, i32) {
    %c0_i32 = arith.constant 0 : i32
    %c0_i32_0 = arith.constant 0 : i32
    %c0_i32_1 = arith.constant 0 : i32
    return %arg0, %c0_i32, %c0_i32_0 : i32, i32, i32
  }
  func.func @transform_1(%arg0: i32) -> (i32, i32) {
    %c0_i32 = arith.constant 0 : i32
    %c0_i32_0 = arith.constant 0 : i32
    %c0_i32_1 = arith.constant 0 : i32
    return %c0_i32, %c0_i32_0 : i32, i32
  }
  func.func @transform_2(%arg0: i32) -> (i32, i32, i32) {
    %c0_i32 = arith.constant 0 : i32
    %c0_i32_0 = arith.constant 0 : i32
    %c0_i32_1 = arith.constant 0 : i32
    return %arg0, %c0_i32, %c0_i32_0 : i32, i32, i32
  }
}

</mosaic_0001>

<bundles_post_ra>
// kernel: rel_pos_emb.1
= control target key start
LH: loop header
LB: loop body
LE: loop exit
PB: predicated region body
PF: predicated region fallthrough
CT: control target
= control target key end

     0   :  { %s2323_s9 = smov 0   ;;  %s3280_s0 = inlined_call_operand.vmem [shape: bf16[2,64,512], index: 0, kind: input, shape index: {}]   ;;  %s3281_s1 = inlined_call_operand.vmem [shape: bf16[512,512], index: 1, kind: input, shape index: {}]   ;;  %s3282_s2 = inlined_call_operand.vmem [shape: f32[2,64,512], index: 2, kind: output, shape index: {}]  }
   0x1 LB: > { %s1559_s10 = sadd.s32 4294967295, %s2306_s9   ;;  %p1563_p0 = scmp.ge.s32.totalorder %s2306_s9, 1  ;;  %s2306_s9 = sphi %s2323_s9, %s12_s9  }
   0x2   : > { %p112_p1 = scmp.lt.s32.totalorder %s2306_s9, 3 }
   0x4   : > { %p113_p2 = pnand %p1563_p0, %p112_p1 }
   0x5   : > { %p134_p3 = scmp.lt.s32.totalorder (!%p113_p2), %s1559_s10, 1 }
   0x6   : > { %116 = sbr.rel (%p113_p2) target bundleno = 432 (0x1b0), region = 28 }
   0xb   : > { %v1746_v0 = vld [vmem:[%s3281_s1 + $0xe0] sm:$0xf]  ;;  %v2194_v1 = vld [vmem:[%s3281_s1 + $0xec] sm:$0xf0]  ;;  %s3284_s10 = smov (!%p134_p3, %s1559_s10), 1 }
   0xc   : > { %v1874_v2 = vld [vmem:[%s3281_s1 + $0x1e0] sm:$0xf]  ;;  %v1747_v3 = vor.u32 %v2194_v1, %v1746_v0  ;;  %v2226_v4 = vld [vmem:[%s3281_s1 + $0x1ec] sm:$0xf0]  ;;  %s2146_s7 = sshll.u32 %s3284_s10, 7  ;;  %s2147_s30 = sshll.u32 %s3284_s10, 8 }
   0xd   : > { %v2002_v5 = vld [vmem:[%s3281_s1 + $0x2e0] sm:$0xf]  ;;  %v2258_v6 = vld [vmem:[%s3281_s1 + $0x2ec] sm:$0xf0]  ;;  %v1875_v7 = vor.u32 %v2226_v4, %v1874_v2  ;;  %s2536_s14 = scalar_lea.vmem %s3280_s0, %s2146_s7  ;;  %s3131_s8 = scalar_lea.vmem %s3282_s2, %s2147_s30 }
   0xe   : > { %v2003_v8 = vor.u32 %v2258_v6, %v2002_v5  ;;  %v2130_v9 = vld [vmem:[%s3281_s1 + $0x3e0] sm:$0xf]  ;;  %v2290_v10 = vld [vmem:[%s3281_s1 + $0x3ec] sm:$0xf0]  ;;  %1008 = vmatpush.bf16.msra.mxu0 %v1747_v3 }
   0xf   : > { %v1730_v11 = vld [vmem:[%s3281_s1 + $0xc0] sm:$0xf]  ;;  %v2131_v12 = vor.u32 %v2290_v10, %v2130_v9  ;;  %v2190_v13 = vld [vmem:[%s3281_s1 + $0xcc] sm:$0xf0]  ;;  %1037 = vmatpush.bf16.msra.mxu1 %v1875_v7 }
  0x10   : > { %v1858_v14 = vld [vmem:[%s3281_s1 + $0x1c0] sm:$0xf]  ;;  %v2222_v15 = vld [vmem:[%s3281_s1 + $0x1cc] sm:$0xf0]  ;;  %1066 = vmatpush.bf16.msra.mxu2 %v2003_v8  ;;  %v1731_v16 = vor.u32 %v2190_v13, %v1730_v11 }
  0x11   : > { %v1859_v17 = vor.u32 %v2222_v15, %v1858_v14  ;;  %v1986_v18 = vld [vmem:[%s3281_s1 + $0x2c0] sm:$0xf]  ;;  %v2254_v19 = vld [vmem:[%s3281_s1 + $0x2cc] sm:$0xf0]  ;;  %1095 = vmatpush.bf16.msra.mxu3 %v2131_v12 }
  0x12   : > { %v2114_v20 = vld [vmem:[%s3281_s1 + $0x3c0] sm:$0xf]  ;;  %v1987_v21 = vor.u32 %v2254_v19, %v1986_v18  ;;  %v2286_v22 = vld [vmem:[%s3281_s1 + $0x3cc] sm:$0xf0]  ;;  %1009 = vmatpush.bf16.msra.mxu0 %v1731_v16 }
  0x13   : > { %v1714_v23 = vld [vmem:[%s3281_s1 + $0xa0] sm:$0xf]  ;;  %v2186_v24 = vld [vmem:[%s3281_s1 + $0xac] sm:$0xf0]  ;;  %v2115_v25 = vor.u32 %v2286_v22, %v2114_v20  ;;  %1038 = vmatpush.bf16.msra.mxu1 %v1859_v17 }
  0x14   : > { %v1842_v26 = vld [vmem:[%s3281_s1 + $0x1a0] sm:$0xf]  ;;  %v2218_v27 = vld [vmem:[%s3281_s1 + $0x1ac] sm:$0xf0]  ;;  %v1715_v29 = vor.u32 %v2186_v24, %v1714_v23  ;;  %1067 = vmatpush.bf16.msra.mxu2 %v1987_v21 }
  0x15   : > { %v1970_v28 = vld [vmem:[%s3281_s1 + $0x2a0] sm:$0xf]  ;;  %v2250_v30 = vld [vmem:[%s3281_s1 + $0x2ac] sm:$0xf0]  ;;  %v1843_v33 = vor.u32 %v2218_v27, %v1842_v26  ;;  %1096 = vmatpush.bf16.msra.mxu3 %v2115_v25 }
  0x16   : > { %v2098_v31 = vld [vmem:[%s3281_s1 + $0x3a0] sm:$0xf]  ;;  %v2282_v32 = vld [vmem:[%s3281_s1 + $0x3ac] sm:$0xf0]  ;;  %v1971_v34 = vor.u32 %v2250_v30, %v1970_v28  ;;  %1010 = vmatpush.bf16.msra.mxu0 %v1715_v29  ;;  %v2256_v28 = vld [vmem:[%s3281_s1 + $0x2e4] sm:$0xf] }
  0x17   : > { %v1698_v35 = vld [vmem:[%s3281_s1 + $0x80] sm:$0xf]  ;;  %v2182_v36 = vld [vmem:[%s3281_s1 + $0x8c] sm:$0xf0]  ;;  %v2099_v38 = vor.u32 %v2282_v32, %v2098_v31  ;;  %1039 = vmatpush.bf16.msra.mxu1 %v1843_v33  ;;  %v2004_v29 = vld [vmem:[%s3281_s1 + $0x2f0] sm:$0xf0] }
  0x18   : > { %v1826_v37 = vld [vmem:[%s3281_s1 + $0x180] sm:$0xf]  ;;  %v2214_v39 = vld [vmem:[%s3281_s1 + $0x18c] sm:$0xf0]  ;;  %v1699_v44 = vor.u32 %v2182_v36, %v1698_v35  ;;  %1068 = vmatpush.bf16.msra.mxu2 %v1971_v34  ;;  %v2288_v30 = vld [vmem:[%s3281_s1 + $0x3e4] sm:$0xf] }
  0x19   : > { %v1954_v40 = vld [vmem:[%s3281_s1 + $0x280] sm:$0xf]  ;;  %v2246_v41 = vld [vmem:[%s3281_s1 + $0x28c] sm:$0xf0]  ;;  %v1827_v45 = vor.u32 %v2214_v39, %v1826_v37  ;;  %1097 = vmatpush.bf16.msra.mxu3 %v2099_v38  ;;  %v2132_v31 = vld [vmem:[%s3281_s1 + $0x3f0] sm:$0xf0] }
  0x1a   : > { %v2082_v42 = vld [vmem:[%s3281_s1 + $0x380] sm:$0xf]  ;;  %v2278_v43 = vld [vmem:[%s3281_s1 + $0x38c] sm:$0xf0]  ;;  %v1955_v46 = vor.u32 %v2246_v41, %v1954_v40  ;;  %1011 = vmatpush.bf16.msra.mxu0 %v1699_v44  ;;  %v2148_v35 = vld [vmem:[%s2536_s14 + $0x4] sm:$0xf] }
  0x1b   : > { %v1682_v47 = vld [vmem:[%s3281_s1 + $0x60] sm:$0xf]  ;;  %v2178_v48 = vld [vmem:[%s3281_s1 + $0x6c] sm:$0xf0]  ;;  %v2083_v50 = vor.u32 %v2278_v43, %v2082_v42  ;;  %1040 = vmatpush.bf16.msra.mxu1 %v1827_v45  ;;  %v2192_v36 = vld [vmem:[%s3281_s1 + $0xe4] sm:$0xf] }
  0x1c   : > { %v1810_v49 = vld [vmem:[%s3281_s1 + $0x160] sm:$0xf]  ;;  %v2210_v51 = vld [vmem:[%s3281_s1 + $0x16c] sm:$0xf0]  ;;  %v1683_v56 = vor.u32 %v2178_v48, %v1682_v47  ;;  %1069 = vmatpush.bf16.msra.mxu2 %v1955_v46  ;;  %v1748_v37 = vld [vmem:[%s3281_s1 + $0xf0] sm:$0xf0]  ;;  %v2007_v46 = vor.u32 %v2256_v28, %v2004_v29 }
  0x1d   : > { %v1938_v52 = vld [vmem:[%s3281_s1 + $0x260] sm:$0xf]  ;;  %v2242_v53 = vld [vmem:[%s3281_s1 + $0x26c] sm:$0xf0]  ;;  %v1811_v57 = vor.u32 %v2210_v51, %v1810_v49  ;;  %1098 = vmatpush.bf16.msra.mxu3 %v2083_v50  ;;  %v1572_v40 = vld [vmem:[%s2536_s14 + $0x10] sm:$0xf0]  ;;  %v2135_v49 = vor.u32 %v2288_v30, %v2132_v31 }
  0x1e   : > { %v2066_v54 = vld [vmem:[%s3281_s1 + $0x360] sm:$0xf]  ;;  %v2274_v55 = vld [vmem:[%s3281_s1 + $0x36c] sm:$0xf0]  ;;  %v1939_v58 = vor.u32 %v2242_v53, %v1938_v52  ;;  %1012 = vmatpush.bf16.msra.mxu0 %v1683_v56  ;;  %v1578_v41 = vld [vmem:[%s2536_s14 + $0x8] sm:$0xf]  ;;  %v2575_v53 = vor.u32 %v2148_v35, %v1572_v40 }
  0x1f   : > { %v1666_v59 = vld [vmem:[%s3281_s1 + $0x40] sm:$0xf]  ;;  %v2174_v60 = vld [vmem:[%s3281_s1 + $0x4c] sm:$0xf0]  ;;  %v2067_v62 = vor.u32 %v2274_v55, %v2066_v54  ;;  %1041 = vmatpush.bf16.msra.mxu1 %v1811_v57  ;;  %v2151_v42 = vld [vmem:[%s2536_s14 + $0x14] sm:$0xf0] }
  0x20   : > { %v1794_v61 = vld [vmem:[%s3281_s1 + $0x140] sm:$0xf]  ;;  %v2206_v63 = vld [vmem:[%s3281_s1 + $0x14c] sm:$0xf0]  ;;  %v1667_v4 = vor.u32 %v2174_v60, %v1666_v59  ;;  %1070 = vmatpush.bf16.msra.mxu2 %v1939_v58  ;;  %v2149_v44 = vld [vmem:[%s2536_s14 + $0xc] sm:$0xf]  ;;  %v2577_v54 = vor.u32 %v2151_v42, %v1578_v41  ;;  %v1751_v58 = vor.u32 %v2192_v36, %v1748_v37 }
  0x21   : > { %v1922_v0 = vld [vmem:[%s3281_s1 + $0x240] sm:$0xf]  ;;  %v2238_v1 = vld [vmem:[%s3281_s1 + $0x24c] sm:$0xf0]  ;;  %v1795_v7 = vor.u32 %v2206_v63, %v1794_v61  ;;  %1099 = vmatpush.bf16.msra.mxu3 %v2067_v62  ;;  %v1580_v45 = vld [vmem:[%s2536_s14 + $0x18] sm:$0xf0] }
  0x22   : > { %v2050_v2 = vld [vmem:[%s3281_s1 + $0x340] sm:$0xf]  ;;  %v2270_v3 = vld [vmem:[%s3281_s1 + $0x34c] sm:$0xf0]  ;;  %v1923_v8 = vor.u32 %v2238_v1, %v1922_v0  ;;  %1013 = vmatpush.bf16.msra.mxu0 %v1667_v4  ;;  %v2224_v47 = vld [vmem:[%s3281_s1 + $0x1e4] sm:$0xf]  ;;  %v2585_v57 = vor.u32 %v2149_v44, %v1580_v45 }
  0x23   : > { %v1650_v5 = vld [vmem:[%s3281_s1 + $0x20] sm:$0xf]  ;;  %v2170_v6 = vld [vmem:[%s3281_s1 + $0x2c] sm:$0xf0]  ;;  %v2051_v12 = vor.u32 %v2270_v3, %v2050_v2  ;;  %1042 = vmatpush.bf16.msra.mxu1 %v1795_v7  ;;  %v1876_v50 = vld [vmem:[%s3281_s1 + $0x1f0] sm:$0xf0] }
  0x24   : > { %v1778_v9 = vld [vmem:[%s3281_s1 + $0x120] sm:$0xf]  ;;  %v2202_v10 = vld [vmem:[%s3281_s1 + $0x12c] sm:$0xf0]  ;;  %v1651_v18 = vor.u32 %v2170_v6, %v1650_v5  ;;  %1071 = vmatpush.bf16.msra.mxu2 %v1923_v8  ;;  %v2252_v51 = vld [vmem:[%s3281_s1 + $0x2c4] sm:$0xf]  ;;  %v1879_v59 = vor.u32 %v2224_v47, %v1876_v50 }
  0x25   : > { %v1906_v11 = vld [vmem:[%s3281_s1 + $0x220] sm:$0xf]  ;;  %v2234_v13 = vld [vmem:[%s3281_s1 + $0x22c] sm:$0xf0]  ;;  %v1779_v21 = vor.u32 %v2202_v10, %v1778_v9  ;;  %1100 = vmatpush.bf16.msra.mxu3 %v2051_v12  ;;  %v1988_v52 = vld [vmem:[%s3281_s1 + $0x2d0] sm:$0xf0] }
  0x26   : > { %v2034_v14 = vld [vmem:[%s3281_s1 + $0x320] sm:$0xf]  ;;  %v2266_v15 = vld [vmem:[%s3281_s1 + $0x32c] sm:$0xf0]  ;;  %v1907_v22 = vor.u32 %v2234_v13, %v1906_v11  ;;  %1014 = vmatpush.bf16.msra.mxu0 %v1651_v18  ;;  %v2284_v55 = vld [vmem:[%s3281_s1 + $0x3c4] sm:$0xf]  ;;  %v1991_v60 = vor.u32 %v2252_v51, %v1988_v52 }
  0x27   : > { %v1634_v16 = vld [vmem:[%s3281_s1] sm:$0xf]  ;;  %v2166_v17 = vld [vmem:[%s3281_s1 + $0xc] sm:$0xf0]  ;;  %v2035_v26 = vor.u32 %v2266_v15, %v2034_v14  ;;  %1043 = vmatpush.bf16.msra.mxu1 %v1779_v21  ;;  %v2116_v56 = vld [vmem:[%s3281_s1 + $0x3d0] sm:$0xf0] }
  0x28   : > { %v1762_v19 = vld [vmem:[%s3281_s1 + $0x100] sm:$0xf]  ;;  %v2198_v20 = vld [vmem:[%s3281_s1 + $0x10c] sm:$0xf0]  ;;  %v1635_v32 = vor.u32 %v2166_v17, %v1634_v16  ;;  %1072 = vmatpush.bf16.msra.mxu2 %v1907_v22  ;;  %v2188_v61 = vld [vmem:[%s3281_s1 + $0xc4] sm:$0xf]  ;;  %v2119_v0 = vor.u32 %v2284_v55, %v2116_v56 }
  0x29   : > { %v1890_v23 = vld [vmem:[%s3281_s1 + $0x200] sm:$0xf]  ;;  %v2230_v24 = vld [vmem:[%s3281_s1 + $0x20c] sm:$0xf0]  ;;  %v1763_v38 = vor.u32 %v2198_v20, %v1762_v19  ;;  %1101 = vmatpush.bf16.msra.mxu3 %v2035_v26  ;;  %v1732_v62 = vld [vmem:[%s3281_s1 + $0xd0] sm:$0xf0] }
  0x2a   : > { %v2018_v25 = vld [vmem:[%s3281_s1 + $0x300] sm:$0xf]  ;;  %v2262_v27 = vld [vmem:[%s3281_s1 + $0x30c] sm:$0xf0]  ;;  %v1891_v39 = vor.u32 %v2230_v24, %v1890_v23  ;;  %1015 = vmatpush.bf16.msra.mxu0 %v1635_v32  ;;  %v2220_v63 = vld [vmem:[%s3281_s1 + $0x1c4] sm:$0xf]  ;;  %v1735_v6 = vor.u32 %v2188_v61, %v1732_v62 }
  0x2b   : > { %v1570_v33 = vld [vmem:[%s2536_s14] sm:$0xf]  ;;  %v2150_v34 = vld [vmem:[%s2536_s14 + $0xc] sm:$0xf0]  ;;  %v2019_v43 = vor.u32 %v2262_v27, %v2018_v25  ;;  %1044 = vmatpush.bf16.msra.mxu1 %v1763_v38  ;;  %v1860_v1 = vld [vmem:[%s3281_s1 + $0x1d0] sm:$0xf0] }
  0x2c   : > { %v2564_v48 = vor.u32 %v2150_v34, %v1570_v33  ;;  %1073 = vmatpush.bf16.msra.mxu2 %v1891_v39  ;;  %v2248_v2 = vld [vmem:[%s3281_s1 + $0x2a4] sm:$0xf]  ;;  %v1972_v3 = vld [vmem:[%s3281_s1 + $0x2b0] sm:$0xf0]  ;;  %v1863_v7 = vor.u32 %v2220_v63, %v1860_v1  ;;  %v1586_v19 = vld [vmem:[%s2536_s14 + $0x20] sm:$0xf] }
  0x2d   : > { %1102 = vmatpush.bf16.msra.mxu3 %v2019_v43  ;;  %v2280_v4 = vld [vmem:[%s3281_s1 + $0x3a4] sm:$0xf]  ;;  %v2100_v5 = vld [vmem:[%s3281_s1 + $0x3b0] sm:$0xf0]  ;;  %v1975_v8 = vor.u32 %v2248_v2, %v1972_v3  ;;  %v2154_v20 = vld [vmem:[%s2536_s14 + $0x2c] sm:$0xf0] }
  0x2e   : > { %1016 = vmatmul.bf16.vlgmr.msra.gmra.mxu0 %v2564_v48  ;;  %1045 = vmatmul.bf16.vlgmr.msra.gmra.mxu1 %v2575_v53  ;;  %v2184_v9 = vld [vmem:[%s3281_s1 + $0xa4] sm:$0xf]  ;;  %v1716_v10 = vld [vmem:[%s3281_s1 + $0xb0] sm:$0xf0]  ;;  %v2103_v12 = vor.u32 %v2280_v4, %v2100_v5  ;;  %v1594_v32 = vld [vmem:[%s2536_s14 + $0x28] sm:$0xf]  ;;  %v2680_v44 = vor.u32 %v2154_v20, %v1586_v19 }
  0x2f   : > { %1074 = vmatmul.bf16.vlgmr.msra.gmra.mxu2 %v2577_v54  ;;  %1124 = vmatpush.bf16.msrb.mxu0 %v1751_v58  ;;  %v2216_v11 = vld [vmem:[%s3281_s1 + $0x1a4] sm:$0xf]  ;;  %v1844_v13 = vld [vmem:[%s3281_s1 + $0x1b0] sm:$0xf0]  ;;  %v1719_v18 = vor.u32 %v2184_v9, %v1716_v10  ;;  %v2155_v35 = vld [vmem:[%s2536_s14 + $0x34] sm:$0xf0] }
  0x30   : > { %1182 = vmatpush.bf16.msrb.mxu2 %v2007_v46  ;;  %1103 = vmatmul.bf16.vlgmr.msra.gmra.mxu3 %v2585_v57  ;;  %v2244_v14 = vld [vmem:[%s3281_s1 + $0x284] sm:$0xf]  ;;  %v1956_v15 = vld [vmem:[%s3281_s1 + $0x290] sm:$0xf0]  ;;  %v1847_v21 = vor.u32 %v2216_v11, %v1844_v13  ;;  %v2153_v36 = vld [vmem:[%s2536_s14 + $0x2c] sm:$0xf]  ;;  %v2693_v51 = vor.u32 %v2155_v35, %v1594_v32 }
  0x31   : > { %1211 = vmatpush.bf16.msrb.mxu3 %v2135_v49  ;;  %1153 = vmatpush.bf16.msrb.mxu1 %v1879_v59  ;;  %v2276_v16 = vld [vmem:[%s3281_s1 + $0x384] sm:$0xf]  ;;  %v2084_v17 = vld [vmem:[%s3281_s1 + $0x390] sm:$0xf0]  ;;  %v1959_v22 = vor.u32 %v2244_v14, %v1956_v15  ;;  %v1596_v37 = vld [vmem:[%s2536_s14 + $0x38] sm:$0xf0] }
  0x32   : > { %v2180_v23 = vld [vmem:[%s3281_s1 + $0x84] sm:$0xf]  ;;  %v1700_v24 = vld [vmem:[%s3281_s1 + $0x90] sm:$0xf0]  ;;  %v2087_v28 = vor.u32 %v2276_v16, %v2084_v17  ;;  %v2701_v56 = vor.u32 %v2153_v36, %v1596_v37 }
  0x33   : > { %1125 = vmatpush.bf16.msrb.mxu0 %v1735_v6  ;;  %v2212_v25 = vld [vmem:[%s3281_s1 + $0x184] sm:$0xf]  ;;  %v1588_v27 = vld [vmem:[%s2536_s14 + $0x30] sm:$0xf0]  ;;  %v1703_v38 = vor.u32 %v2180_v23, %v1700_v24 }
  0x34   : > { %1183 = vmatpush.bf16.msrb.mxu2 %v1991_v60  ;;  %v2152_v26 = vld [vmem:[%s2536_s14 + $0x24] sm:$0xf]  ;;  %v1828_v29 = vld [vmem:[%s3281_s1 + $0x190] sm:$0xf0] }
  0x35   : > { %1212 = vmatpush.bf16.msrb.mxu3 %v2119_v0  ;;  %1154 = vmatpush.bf16.msrb.mxu1 %v1863_v7  ;;  %v2240_v30 = vld [vmem:[%s3281_s1 + $0x264] sm:$0xf]  ;;  %v1940_v31 = vld [vmem:[%s3281_s1 + $0x270] sm:$0xf0]  ;;  %v1831_v39 = vor.u32 %v2212_v25, %v1828_v29  ;;  %v2691_v50 = vor.u32 %v2152_v26, %v1588_v27  ;;  %v1602_v26 = vld [vmem:[%s2536_s14 + $0x40] sm:$0xf] }
  0x36   : > { %v2272_v33 = vld [vmem:[%s3281_s1 + $0x364] sm:$0xf]  ;;  %v2068_v34 = vld [vmem:[%s3281_s1 + $0x370] sm:$0xf0]  ;;  %v1943_v40 = vor.u32 %v2240_v30, %v1940_v31  ;;  %v2158_v27 = vld [vmem:[%s2536_s14 + $0x4c] sm:$0xf0] }
  0x37   : > { %1126 = vmatpush.bf16.msrb.mxu0 %v1719_v18  ;;  %v2176_v41 = vld [vmem:[%s3281_s1 + $0x64] sm:$0xf]  ;;  %v1684_v42 = vld [vmem:[%s3281_s1 + $0x70] sm:$0xf0]  ;;  %v2071_v45 = vor.u32 %v2272_v33, %v2068_v34  ;;  %v1610_v30 = vld [vmem:[%s2536_s14 + $0x48] sm:$0xf]  ;;  %v2775_v36 = vor.u32 %v2158_v27, %v1602_v26 }
  0x38   : > { %1184 = vmatpush.bf16.msrb.mxu2 %v1975_v8  ;;  %v2208_v43 = vld [vmem:[%s3281_s1 + $0x164] sm:$0xf]  ;;  %v1812_v46 = vld [vmem:[%s3281_s1 + $0x170] sm:$0xf0]  ;;  %v1687_v58 = vor.u32 %v2176_v41, %v1684_v42  ;;  %v2159_v31 = vld [vmem:[%s2536_s14 + $0x54] sm:$0xf0] }
  0x39   : > { %1213 = vmatpush.bf16.msrb.mxu3 %v2103_v12  ;;  %1155 = vmatpush.bf16.msrb.mxu1 %v1847_v21  ;;  %v2236_v47 = vld [vmem:[%s3281_s1 + $0x244] sm:$0xf]  ;;  %v1924_v49 = vld [vmem:[%s3281_s1 + $0x250] sm:$0xf0]  ;;  %v1815_v59 = vor.u32 %v2208_v43, %v1812_v46  ;;  %v2157_v33 = vld [vmem:[%s2536_s14 + $0x4c] sm:$0xf] }
  0x3a   : > { %v2268_v52 = vld [vmem:[%s3281_s1 + $0x344] sm:$0xf]  ;;  %v2052_v55 = vld [vmem:[%s3281_s1 + $0x350] sm:$0xf0]  ;;  %v1927_v60 = vor.u32 %v2236_v47, %v1924_v49  ;;  %v1612_v34 = vld [vmem:[%s2536_s14 + $0x58] sm:$0xf0] }
  0x3b   : > { %1127 = vmatpush.bf16.msrb.mxu0 %v1703_v38  ;;  %v2172_v61 = vld [vmem:[%s3281_s1 + $0x44] sm:$0xf]  ;;  %v1668_v62 = vld [vmem:[%s3281_s1 + $0x50] sm:$0xf0]  ;;  %v2055_v63 = vor.u32 %v2268_v52, %v2052_v55  ;;  %v2779_v38 = vor.u32 %v2159_v31, %v1610_v30  ;;  %v2259_v41 = vld [vmem:[%s3281_s1 + $0x2f4] sm:$0xf0] }
  0x3c   : > { %1185 = vmatpush.bf16.msrb.mxu2 %v1959_v22  ;;  %v2204_v0 = vld [vmem:[%s3281_s1 + $0x144] sm:$0xf]  ;;  %v1796_v1 = vld [vmem:[%s3281_s1 + $0x150] sm:$0xf0]  ;;  %v1671_v2 = vor.u32 %v2172_v61, %v1668_v62  ;;  %v2138_v42 = vld [vmem:[%s3281_s1 + $0x3e8] sm:$0xf] }
  0x3d   : > { %1214 = vmatpush.bf16.msrb.mxu3 %v2087_v28  ;;  %1156 = vmatpush.bf16.msrb.mxu1 %v1831_v39  ;;  %v2232_v3 = vld [vmem:[%s3281_s1 + $0x224] sm:$0xf]  ;;  %v1908_v4 = vld [vmem:[%s3281_s1 + $0x230] sm:$0xf0]  ;;  %v1799_v6 = vor.u32 %v2204_v0, %v1796_v1  ;;  %v2781_v39 = vor.u32 %v2157_v33, %v1612_v34  ;;  %v1754_v46 = vld [vmem:[%s3281_s1 + $0xe8] sm:$0xf] }
  0x3e   : > { %1021 = vmatmul.bf16.gmra.mxu0 %v2680_v44  ;;  %1050 = vmatmul.bf16.gmra.mxu1 %v2691_v50  ;;  %v2264_v5 = vld [vmem:[%s3281_s1 + $0x324] sm:$0xf]  ;;  %v1911_v7 = vor.u32 %v2232_v3, %v1908_v4  ;;  %v2036_v8 = vld [vmem:[%s3281_s1 + $0x330] sm:$0xf0]  ;;  %v2195_v47 = vld [vmem:[%s3281_s1 + $0xf4] sm:$0xf0] }
  0x3f   : > { %1079 = vmatmul.bf16.gmra.mxu2 %v2693_v51  ;;  %1128 = vmatpush.bf16.msrb.mxu0 %v1687_v58  ;;  %v2168_v9 = vld [vmem:[%s3281_s1 + $0x24] sm:$0xf]  ;;  %v1652_v10 = vld [vmem:[%s3281_s1 + $0x30] sm:$0xf0]  ;;  %v2039_v11 = vor.u32 %v2264_v5, %v2036_v8  ;;  %v1755_v52 = vor.u32 %v2195_v47, %v1754_v46  ;;  %v1882_v55 = vld [vmem:[%s3281_s1 + $0x1e8] sm:$0xf] }
  0x40   : > { %1186 = vmatpush.bf16.msrb.mxu2 %v1943_v40  ;;  %1108 = vmatmul.bf16.gmra.mxu3 %v2701_v56  ;;  %v2200_v12 = vld [vmem:[%s3281_s1 + $0x124] sm:$0xf]  ;;  %v1780_v13 = vld [vmem:[%s3281_s1 + $0x130] sm:$0xf0]  ;;  %v1655_v18 = vor.u32 %v2168_v9, %v1652_v10  ;;  %v2010_v40 = vld [vmem:[%s3281_s1 + $0x2e8] sm:$0xf] }
  0x41   : > { %1215 = vmatpush.bf16.msrb.mxu3 %v2071_v45  ;;  %1157 = vmatpush.bf16.msrb.mxu1 %v1815_v59  ;;  %v2228_v14 = vld [vmem:[%s3281_s1 + $0x204] sm:$0xf]  ;;  %v1892_v15 = vld [vmem:[%s3281_s1 + $0x210] sm:$0xf0]  ;;  %v1783_v19 = vor.u32 %v2200_v12, %v1780_v13  ;;  %v2011_v43 = vor.u32 %v2259_v41, %v2010_v40  ;;  %v2291_v45 = vld [vmem:[%s3281_s1 + $0x3f4] sm:$0xf0] }
  0x42   : > { %v2260_v16 = vld [vmem:[%s3281_s1 + $0x304] sm:$0xf]  ;;  %v2020_v17 = vld [vmem:[%s3281_s1 + $0x310] sm:$0xf0]  ;;  %v1895_v20 = vor.u32 %v2228_v14, %v1892_v15  ;;  %v2139_v49 = vor.u32 %v2291_v45, %v2138_v42  ;;  %v2227_v58 = vld [vmem:[%s3281_s1 + $0x1f4] sm:$0xf0] }
  0x43   : > { %1129 = vmatpush.bf16.msrb.mxu0 %v1671_v2  ;;  %v2164_v21 = vld [vmem:[%s3281_s1 + $0x4] sm:$0xf]  ;;  %v1636_v22 = vld [vmem:[%s3281_s1 + $0x10] sm:$0xf0]  ;;  %v2023_v23 = vor.u32 %v2260_v16, %v2020_v17  ;;  %v1994_v59 = vld [vmem:[%s3281_s1 + $0x2c8] sm:$0xf] }
  0x44   : > { %1187 = vmatpush.bf16.msrb.mxu2 %v1927_v60  ;;  %v2196_v24 = vld [vmem:[%s3281_s1 + $0x104] sm:$0xf]  ;;  %v1764_v25 = vld [vmem:[%s3281_s1 + $0x110] sm:$0xf0]  ;;  %v1639_v32 = vor.u32 %v2164_v21, %v1636_v22  ;;  %v1883_v60 = vor.u32 %v2227_v58, %v1882_v55  ;;  %v2255_v61 = vld [vmem:[%s3281_s1 + $0x2d4] sm:$0xf0] }
  0x45   : > { %1216 = vmatpush.bf16.msrb.mxu3 %v2055_v63  ;;  %1158 = vmatpush.bf16.msrb.mxu1 %v1799_v6  ;;  %v2156_v28 = vld [vmem:[%s2536_s14 + $0x44] sm:$0xf]  ;;  %v1604_v29 = vld [vmem:[%s2536_s14 + $0x50] sm:$0xf0]  ;;  %v1767_v35 = vor.u32 %v2196_v24, %v1764_v25  ;;  %v2122_v62 = vld [vmem:[%s3281_s1 + $0x3c8] sm:$0xf]  ;;  %v1995_v0 = vor.u32 %v2255_v61, %v1994_v59 }
  0x46   : > { %v2777_v37 = vor.u32 %v2156_v28, %v1604_v29  ;;  %v2287_v63 = vld [vmem:[%s3281_s1 + $0x3d4] sm:$0xf0]  ;;  %v1738_v2 = vld [vmem:[%s3281_s1 + $0xc8] sm:$0xf]  ;;  %v1618_v8 = vld [vmem:[%s2536_s14 + $0x60] sm:$0xf] }
  0x47   : > { %1130 = vmatpush.bf16.msrb.mxu0 %v1655_v18  ;;  %v2123_v1 = vor.u32 %v2287_v63, %v2122_v62  ;;  %v2191_v3 = vld [vmem:[%s3281_s1 + $0xd4] sm:$0xf0]  ;;  %v1866_v4 = vld [vmem:[%s3281_s1 + $0x1c8] sm:$0xf]  ;;  %v2162_v9 = vld [vmem:[%s2536_s14 + $0x6c] sm:$0xf0] }
  0x48   : > { %1188 = vmatpush.bf16.msrb.mxu2 %v1911_v7  ;;  %v1739_v5 = vor.u32 %v2191_v3, %v1738_v2  ;;  %v2223_v6 = vld [vmem:[%s3281_s1 + $0x1d4] sm:$0xf0]  ;;  %v2160_v10 = vld [vmem:[%s2536_s14 + $0x64] sm:$0xf]  ;;  %v1626_v12 = vld [vmem:[%s2536_s14 + $0x68] sm:$0xf]  ;;  %v2843_v16 = vor.u32 %v2162_v9, %v1618_v8 }
  0x49   : > { %1217 = vmatpush.bf16.msrb.mxu3 %v2039_v11  ;;  %1159 = vmatpush.bf16.msrb.mxu1 %v1783_v19  ;;  %v1867_v7 = vor.u32 %v2223_v6, %v1866_v4  ;;  %v1620_v11 = vld [vmem:[%s2536_s14 + $0x70] sm:$0xf0]  ;;  %v2163_v13 = vld [vmem:[%s2536_s14 + $0x74] sm:$0xf0]  ;;  %v2161_v14 = vld [vmem:[%s2536_s14 + $0x6c] sm:$0xf] }
  0x4a   : > { %v1628_v15 = vld [vmem:[%s2536_s14 + $0x78] sm:$0xf0]  ;;  %v2845_v17 = vor.u32 %v2160_v10, %v1620_v11  ;;  %v2847_v18 = vor.u32 %v2163_v13, %v1626_v12  ;;  %v2251_v21 = vld [vmem:[%s3281_s1 + $0x2b4] sm:$0xf0]  ;;  %v2106_v22 = vld [vmem:[%s3281_s1 + $0x3a8] sm:$0xf] }
  0x4b   : > { %1131 = vmatpush.bf16.msrb.mxu0 %v1639_v32  ;;  %v2849_v19 = vor.u32 %v2161_v14, %v1628_v15  ;;  %v2283_v24 = vld [vmem:[%s3281_s1 + $0x3b4] sm:$0xf0]  ;;  %v1722_v25 = vld [vmem:[%s3281_s1 + $0xa8] sm:$0xf] }
  0x4c   : > { %1189 = vmatpush.bf16.msrb.mxu2 %v1895_v20  ;;  %v1978_v20 = vld [vmem:[%s3281_s1 + $0x2a8] sm:$0xf]  ;;  %v2187_v26 = vld [vmem:[%s3281_s1 + $0xb4] sm:$0xf0]  ;;  %v2107_v27 = vor.u32 %v2283_v24, %v2106_v22 }
  0x4d   : > { %1218 = vmatpush.bf16.msrb.mxu3 %v2023_v23  ;;  %1160 = vmatpush.bf16.msrb.mxu1 %v1767_v35  ;;  %v1979_v23 = vor.u32 %v2251_v21, %v1978_v20  ;;  %v1723_v28 = vor.u32 %v2187_v26, %v1722_v25  ;;  %v1850_v29 = vld [vmem:[%s3281_s1 + $0x1a8] sm:$0xf]  ;;  %v2219_v30 = vld [vmem:[%s3281_s1 + $0x1b4] sm:$0xf0] }
  0x4e   : > { %1026 = vmatmul.bf16.gmra.mxu0 %v2775_v36  ;;  %1055 = vmatmul.bf16.gmra.mxu1 %v2777_v37  ;;  %v1962_v31 = vld [vmem:[%s3281_s1 + $0x288] sm:$0xf]  ;;  %v1851_v32 = vor.u32 %v2219_v30, %v1850_v29  ;;  %v2247_v33 = vld [vmem:[%s3281_s1 + $0x294] sm:$0xf0] }
  0x4f   : > { %1084 = vmatmul.bf16.gmra.mxu2 %v2779_v38  ;;  %1240 = vmatpush.bf16.msra.mxu0 %v1755_v52  ;;  %v2090_v34 = vld [vmem:[%s3281_s1 + $0x388] sm:$0xf]  ;;  %v2279_v35 = vld [vmem:[%s3281_s1 + $0x394] sm:$0xf0]  ;;  %v1963_v40 = vor.u32 %v2247_v33, %v1962_v31 }
  0x50   : > { %1113 = vmatmul.bf16.gmra.mxu3 %v2781_v39  ;;  %1298 = vmatpush.bf16.msra.mxu2 %v2011_v43  ;;  %v2091_v41 = vor.u32 %v2279_v35, %v2090_v34  ;;  %v1706_v42 = vld [vmem:[%s3281_s1 + $0x88] sm:$0xf]  ;;  %v2183_v43 = vld [vmem:[%s3281_s1 + $0x94] sm:$0xf0] }
  0x51   : > { %1327 = vmatpush.bf16.msra.mxu3 %v2139_v49  ;;  %1269 = vmatpush.bf16.msra.mxu1 %v1883_v60  ;;  %v1834_v45 = vld [vmem:[%s3281_s1 + $0x188] sm:$0xf]  ;;  %v1707_v46 = vor.u32 %v2183_v43, %v1706_v42  ;;  %v2215_v47 = vld [vmem:[%s3281_s1 + $0x194] sm:$0xf0] }
  0x52   : > { %v1835_v49 = vor.u32 %v2215_v47, %v1834_v45  ;;  %v1946_v52 = vld [vmem:[%s3281_s1 + $0x268] sm:$0xf]  ;;  %v2243_v55 = vld [vmem:[%s3281_s1 + $0x274] sm:$0xf0] }
  0x53   : > { %1241 = vmatpush.bf16.msra.mxu0 %v1739_v5  ;;  %v2074_v58 = vld [vmem:[%s3281_s1 + $0x368] sm:$0xf]  ;;  %v1947_v59 = vor.u32 %v2243_v55, %v1946_v52  ;;  %v2275_v60 = vld [vmem:[%s3281_s1 + $0x374] sm:$0xf0]  ;;  %v2257_v52 = vld [vmem:[%s3281_s1 + $0x2ec] sm:$0xf] }
  0x54   : > { %1299 = vmatpush.bf16.msra.mxu2 %v1995_v0  ;;  %v1690_v61 = vld [vmem:[%s3281_s1 + $0x68] sm:$0xf]  ;;  %v2179_v62 = vld [vmem:[%s3281_s1 + $0x74] sm:$0xf0]  ;;  %v2075_v63 = vor.u32 %v2275_v60, %v2074_v58  ;;  %v2012_v55 = vld [vmem:[%s3281_s1 + $0x2f8] sm:$0xf0] }
  0x55   : > { %1328 = vmatpush.bf16.msra.mxu3 %v2123_v1  ;;  %1270 = vmatpush.bf16.msra.mxu1 %v1867_v7  ;;  %v1691_v0 = vor.u32 %v2179_v62, %v1690_v61  ;;  %v1818_v1 = vld [vmem:[%s3281_s1 + $0x168] sm:$0xf]  ;;  %v2211_v2 = vld [vmem:[%s3281_s1 + $0x174] sm:$0xf0]  ;;  %v2289_v58 = vld [vmem:[%s3281_s1 + $0x3ec] sm:$0xf] }
  0x56   : > { %v1930_v3 = vld [vmem:[%s3281_s1 + $0x248] sm:$0xf]  ;;  %v1819_v4 = vor.u32 %v2211_v2, %v1818_v1  ;;  %v2239_v5 = vld [vmem:[%s3281_s1 + $0x254] sm:$0xf0]  ;;  %v2140_v60 = vld [vmem:[%s3281_s1 + $0x3f8] sm:$0xf0] }
  0x57   : > { %1242 = vmatpush.bf16.msra.mxu0 %v1723_v28  ;;  %v2058_v6 = vld [vmem:[%s3281_s1 + $0x348] sm:$0xf]  ;;  %v2271_v7 = vld [vmem:[%s3281_s1 + $0x354] sm:$0xf0]  ;;  %v1931_v8 = vor.u32 %v2239_v5, %v1930_v3  ;;  %v2143_v61 = vor.u32 %v2289_v58, %v2140_v60  ;;  %v2193_v62 = vld [vmem:[%s3281_s1 + $0xec] sm:$0xf] }
  0x58   : > { %1300 = vmatpush.bf16.msra.mxu2 %v1979_v23  ;;  %v2059_v9 = vor.u32 %v2271_v7, %v2058_v6  ;;  %v1674_v10 = vld [vmem:[%s3281_s1 + $0x48] sm:$0xf]  ;;  %v2175_v11 = vld [vmem:[%s3281_s1 + $0x54] sm:$0xf0]  ;;  %v1884_v2 = vld [vmem:[%s3281_s1 + $0x1f8] sm:$0xf0] }
  0x59   : > { %1329 = vmatpush.bf16.msra.mxu3 %v2107_v27  ;;  %1271 = vmatpush.bf16.msra.mxu1 %v1851_v32  ;;  %v1802_v12 = vld [vmem:[%s3281_s1 + $0x148] sm:$0xf]  ;;  %v1675_v13 = vor.u32 %v2175_v11, %v1674_v10  ;;  %v2207_v14 = vld [vmem:[%s3281_s1 + $0x154] sm:$0xf0]  ;;  %v2253_v3 = vld [vmem:[%s3281_s1 + $0x2cc] sm:$0xf] }
  0x5a   : > { %v1803_v15 = vor.u32 %v2207_v14, %v1802_v12  ;;  %v1914_v20 = vld [vmem:[%s3281_s1 + $0x228] sm:$0xf]  ;;  %v2235_v21 = vld [vmem:[%s3281_s1 + $0x234] sm:$0xf0]  ;;  %v2285_v7 = vld [vmem:[%s3281_s1 + $0x3cc] sm:$0xf] }
  0x5b   : > { %1243 = vmatpush.bf16.msra.mxu0 %v1707_v46  ;;  %v2042_v22 = vld [vmem:[%s3281_s1 + $0x328] sm:$0xf]  ;;  %v1915_v23 = vor.u32 %v2235_v21, %v1914_v20  ;;  %v2267_v24 = vld [vmem:[%s3281_s1 + $0x334] sm:$0xf0]  ;;  %v2189_v10 = vld [vmem:[%s3281_s1 + $0xcc] sm:$0xf] }
  0x5c   : > { %1301 = vmatpush.bf16.msra.mxu2 %v1963_v40  ;;  %v1658_v25 = vld [vmem:[%s3281_s1 + $0x28] sm:$0xf]  ;;  %v2171_v26 = vld [vmem:[%s3281_s1 + $0x34] sm:$0xf0]  ;;  %v2043_v27 = vor.u32 %v2267_v24, %v2042_v22  ;;  %v1740_v11 = vld [vmem:[%s3281_s1 + $0xd8] sm:$0xf0] }
  0x5d   : > { %1330 = vmatpush.bf16.msra.mxu3 %v2091_v41  ;;  %1272 = vmatpush.bf16.msra.mxu1 %v1835_v49  ;;  %v1659_v28 = vor.u32 %v2171_v26, %v1658_v25  ;;  %v1786_v29 = vld [vmem:[%s3281_s1 + $0x128] sm:$0xf]  ;;  %v2203_v30 = vld [vmem:[%s3281_s1 + $0x134] sm:$0xf0]  ;;  %v2221_v12 = vld [vmem:[%s3281_s1 + $0x1cc] sm:$0xf] }
  0x5e   : > { %1031 = vmatmul.bf16.gmra.mxu0 %v2843_v16  ;;  %1060 = vmatmul.bf16.gmra.mxu1 %v2845_v17  ;;  %v1898_v31 = vld [vmem:[%s3281_s1 + $0x208] sm:$0xf]  ;;  %v1787_v32 = vor.u32 %v2203_v30, %v1786_v29  ;;  %v2231_v33 = vld [vmem:[%s3281_s1 + $0x214] sm:$0xf0]  ;;  %v1868_v14 = vld [vmem:[%s3281_s1 + $0x1d8] sm:$0xf0] }
  0x5f   : > { %1089 = vmatmul.bf16.gmra.mxu2 %v2847_v18  ;;  %1244 = vmatpush.bf16.msra.mxu0 %v1691_v0  ;;  %v2026_v34 = vld [vmem:[%s3281_s1 + $0x308] sm:$0xf]  ;;  %v2263_v35 = vld [vmem:[%s3281_s1 + $0x314] sm:$0xf0]  ;;  %v1899_v40 = vor.u32 %v2231_v33, %v1898_v31  ;;  %v2225_v0 = vld [vmem:[%s3281_s1 + $0x1ec] sm:$0xf]  ;;  %v1871_v21 = vor.u32 %v2221_v12, %v1868_v14 }
  0x60   : > { %1118 = vmatmul.bf16.gmra.mxu3 %v2849_v19  ;;  %1302 = vmatpush.bf16.msra.mxu2 %v1947_v59  ;;  %v2027_v41 = vor.u32 %v2263_v35, %v2026_v34  ;;  %v1642_v42 = vld [vmem:[%s3281_s1 + $0x8] sm:$0xf]  ;;  %v2167_v43 = vld [vmem:[%s3281_s1 + $0x14] sm:$0xf0]  ;;  %v2015_v59 = vor.u32 %v2257_v52, %v2012_v55  ;;  %v1887_v5 = vor.u32 %v2225_v0, %v1884_v2  ;;  %v1980_v20 = vld [vmem:[%s3281_s1 + $0x2b8] sm:$0xf0] }
  0x61   : > { %1331 = vmatpush.bf16.msra.mxu3 %v2075_v63  ;;  %1273 = vmatpush.bf16.msra.mxu1 %v1819_v4  ;;  %v1770_v45 = vld [vmem:[%s3281_s1 + $0x108] sm:$0xf]  ;;  %v1643_v46 = vor.u32 %v2167_v43, %v1642_v42  ;;  %v2199_v47 = vld [vmem:[%s3281_s1 + $0x114] sm:$0xf0]  ;;  %v1756_v63 = vld [vmem:[%s3281_s1 + $0xf8] sm:$0xf0] }
  0x62   : > { %v1771_v49 = vor.u32 %v2199_v47, %v1770_v45  ;;  %v1759_v1 = vor.u32 %v2193_v62, %v1756_v63  ;;  %v1996_v4 = vld [vmem:[%s3281_s1 + $0x2d8] sm:$0xf0]  ;;  %v2185_v26 = vld [vmem:[%s3281_s1 + $0xac] sm:$0xf] }
  0x63   : > { %1245 = vmatpush.bf16.msra.mxu0 %v1675_v13  ;;  %v1999_v6 = vor.u32 %v2253_v3, %v1996_v4  ;;  %v1743_v13 = vor.u32 %v2189_v10, %v1740_v11  ;;  %v2108_v24 = vld [vmem:[%s3281_s1 + $0x3b8] sm:$0xf0]  ;;  %v2245_v31 = vld [vmem:[%s3281_s1 + $0x28c] sm:$0xf] }
  0x64   : > { %1303 = vmatpush.bf16.msra.mxu2 %v1931_v8  ;;  %v2124_v8 = vld [vmem:[%s3281_s1 + $0x3d8] sm:$0xf0]  ;;  %v2277_v35 = vld [vmem:[%s3281_s1 + $0x38c] sm:$0xf] }
  0x65   : > { %1332 = vmatpush.bf16.msra.mxu3 %v2059_v9  ;;  %1274 = vmatpush.bf16.msra.mxu1 %v1803_v15  ;;  %v2127_v9 = vor.u32 %v2285_v7, %v2124_v8  ;;  %v2249_v15 = vld [vmem:[%s3281_s1 + $0x2ac] sm:$0xf]  ;;  %v1852_v30 = vld [vmem:[%s3281_s1 + $0x1b8] sm:$0xf0] }
  0x66   : > { %v1983_v22 = vor.u32 %v2249_v15, %v1980_v20  ;;  %v1708_v47 = vld [vmem:[%s3281_s1 + $0x98] sm:$0xf0]  ;;  %v2241_v58 = vld [vmem:[%s3281_s1 + $0x26c] sm:$0xf] }
  0x67   : > { %1246 = vmatpush.bf16.msra.mxu0 %v1659_v28  ;;  %v2217_v28 = vld [vmem:[%s3281_s1 + $0x1ac] sm:$0xf]  ;;  %v1836_v55 = vld [vmem:[%s3281_s1 + $0x198] sm:$0xf0] }
  0x68   : > { %1304 = vmatpush.bf16.msra.mxu2 %v1915_v23  ;;  %v2281_v23 = vld [vmem:[%s3281_s1 + $0x3ac] sm:$0xf]  ;;  %v1855_v33 = vor.u32 %v2217_v28, %v1852_v30  ;;  %v2076_v63 = vld [vmem:[%s3281_s1 + $0x378] sm:$0xf0] }
  0x69   : > { %1333 = vmatpush.bf16.msra.mxu3 %v2043_v27  ;;  %1275 = vmatpush.bf16.msra.mxu1 %v1787_v32  ;;  %v2111_v25 = vor.u32 %v2281_v23, %v2108_v24  ;;  %v1724_v27 = vld [vmem:[%s3281_s1 + $0xb8] sm:$0xf0]  ;;  %v2273_v62 = vld [vmem:[%s3281_s1 + $0x36c] sm:$0xf] }
  0x6a   : > { %v1727_v29 = vor.u32 %v2185_v26, %v1724_v27  ;;  %v1964_v32 = vld [vmem:[%s3281_s1 + $0x298] sm:$0xf0]  ;;  %v2177_v7 = vld [vmem:[%s3281_s1 + $0x6c] sm:$0xf] }
  0x6b   : > { %1247 = vmatpush.bf16.msra.mxu0 %v1643_v46  ;;  %v1967_v34 = vor.u32 %v2245_v31, %v1964_v32  ;;  %v2181_v46 = vld [vmem:[%s3281_s1 + $0x8c] sm:$0xf]  ;;  %v1692_v8 = vld [vmem:[%s3281_s1 + $0x78] sm:$0xf0] }
  0x6c   : > { %1305 = vmatpush.bf16.msra.mxu2 %v1899_v40  ;;  %v2092_v40 = vld [vmem:[%s3281_s1 + $0x398] sm:$0xf0]  ;;  %v1711_v52 = vor.u32 %v2181_v46, %v1708_v47  ;;  %v1695_v10 = vor.u32 %v2177_v7, %v1692_v8  ;;  %v2237_v12 = vld [vmem:[%s3281_s1 + $0x24c] sm:$0xf] }
  0x6d   : > { %1334 = vmatpush.bf16.msra.mxu3 %v2027_v41  ;;  %1276 = vmatpush.bf16.msra.mxu1 %v1771_v49  ;;  %v2095_v41 = vor.u32 %v2277_v35, %v2092_v40  ;;  %v2213_v49 = vld [vmem:[%s3281_s1 + $0x18c] sm:$0xf]  ;;  %v1820_v11 = vld [vmem:[%s3281_s1 + $0x178] sm:$0xf0] }
  0x6e   : > { %1132 = vmatmul.bf16.vlgmr.msrb.gmra.mxu0 %v2564_v48  ;;  %1161 = vmatmul.bf16.vlgmr.msrb.gmra.mxu1 %v2575_v53  ;;  %v1839_v60 = vor.u32 %v2213_v49, %v1836_v55  ;;  %v2173_v31 = vld [vmem:[%s3281_s1 + $0x4c] sm:$0xf]  ;;  %v1676_v32 = vld [vmem:[%s3281_s1 + $0x58] sm:$0xf0] }
  0x6f   : > { %1190 = vmatmul.bf16.vlgmr.msrb.gmra.mxu2 %v2577_v54  ;;  %1356 = vmatpush.bf16.msrb.mxu0 %v1759_v1  ;;  %v2079_v1 = vor.u32 %v2273_v62, %v2076_v63  ;;  %v1804_v35 = vld [vmem:[%s3281_s1 + $0x158] sm:$0xf0]  ;;  %v2233_v40 = vld [vmem:[%s3281_s1 + $0x22c] sm:$0xf] }
  0x70   : > { %1219 = vmatmul.bf16.vlgmr.msrb.gmra.mxu3 %v2585_v57  ;;  %1414 = vmatpush.bf16.msrb.mxu2 %v2015_v59  ;;  %v1948_v59 = vld [vmem:[%s3281_s1 + $0x278] sm:$0xf0]  ;;  %v2201_v63 = vld [vmem:[%s3281_s1 + $0x12c] sm:$0xf] }
  0x71   : > { %1443 = vmatpush.bf16.msrb.mxu3 %v2143_v61  ;;  %1385 = vmatpush.bf16.msrb.mxu1 %v1887_v5  ;;  %v1951_v61 = vor.u32 %v2241_v58, %v1948_v59  ;;  %v1660_v62 = vld [vmem:[%s3281_s1 + $0x38] sm:$0xf0] }
  0x73   : > { %1357 = vmatpush.bf16.msrb.mxu0 %v1743_v13  ;;  %v1932_v13 = vld [vmem:[%s3281_s1 + $0x258] sm:$0xf0] }
  0x74   : > { %1415 = vmatpush.bf16.msrb.mxu2 %v1999_v6  ;;  %v1935_v20 = vor.u32 %v2237_v12, %v1932_v13  ;;  %v1644_v12 = vld [vmem:[%s3281_s1 + $0x18] sm:$0xf0]  ;;  %v2197_v13 = vld [vmem:[%s3281_s1 + $0x10c] sm:$0xf] }
  0x75   : > { %1444 = vmatpush.bf16.msrb.mxu3 %v2127_v9  ;;  %1386 = vmatpush.bf16.msrb.mxu1 %v1871_v21  ;;  %v2209_v9 = vld [vmem:[%s3281_s1 + $0x16c] sm:$0xf] }
  0x76   : > { %v1823_v15 = vor.u32 %v2209_v9, %v1820_v11  ;;  %v2269_v21 = vld [vmem:[%s3281_s1 + $0x34c] sm:$0xf] }
  0x77   : > { %1358 = vmatpush.bf16.msrb.mxu0 %v1727_v29  ;;  %v2165_v11 = vld [vmem:[%s3281_s1 + $0xc] sm:$0xf] }
  0x78   : > { %1416 = vmatpush.bf16.msrb.mxu2 %v1983_v22  ;;  %v2060_v22 = vld [vmem:[%s3281_s1 + $0x358] sm:$0xf0] }
  0x79   : > { %1445 = vmatpush.bf16.msrb.mxu3 %v2111_v25  ;;  %1387 = vmatpush.bf16.msrb.mxu1 %v1855_v33  ;;  %v2063_v24 = vor.u32 %v2269_v21, %v2060_v22  ;;  %v1679_v33 = vor.u32 %v2173_v31, %v1676_v32  ;;  %v1647_v21 = vor.u32 %v2165_v11, %v1644_v12  ;;  %v1772_v22 = vld [vmem:[%s3281_s1 + $0x118] sm:$0xf0] }
  0x7b   : > { %1359 = vmatpush.bf16.msrb.mxu0 %v1711_v52 }
  0x7c   : > { %1417 = vmatpush.bf16.msrb.mxu2 %v1967_v34  ;;  %v2205_v34 = vld [vmem:[%s3281_s1 + $0x14c] sm:$0xf] }
  0x7d   : > { %1446 = vmatpush.bf16.msrb.mxu3 %v2095_v41  ;;  %1388 = vmatpush.bf16.msrb.mxu1 %v1839_v60  ;;  %v1807_v41 = vor.u32 %v2205_v34, %v1804_v35 }
  0x7e   : > { %1137 = vmatmul.bf16.gmra.mxu0 %v2680_v44  ;;  %1166 = vmatmul.bf16.gmra.mxu1 %v2691_v50 }
  0x7f   : > { %1195 = vmatmul.bf16.gmra.mxu2 %v2693_v51  ;;  %1360 = vmatpush.bf16.msrb.mxu0 %v1695_v10 }
  0x80   : > { %1224 = vmatmul.bf16.gmra.mxu3 %v2701_v56  ;;  %1418 = vmatpush.bf16.msrb.mxu2 %v1951_v61  ;;  %v2169_v61 = vld [vmem:[%s3281_s1 + $0x2c] sm:$0xf] }
  0x81   : > { %1447 = vmatpush.bf16.msrb.mxu3 %v2079_v1  ;;  %1389 = vmatpush.bf16.msrb.mxu1 %v1823_v15  ;;  %v1788_v1 = vld [vmem:[%s3281_s1 + $0x138] sm:$0xf0] }
  0x83   : > { %1361 = vmatpush.bf16.msrb.mxu0 %v1679_v33 }
  0x84   : > { %1419 = vmatpush.bf16.msrb.mxu2 %v1935_v20 }
  0x85   : > { %1448 = vmatpush.bf16.msrb.mxu3 %v2063_v24  ;;  %1390 = vmatpush.bf16.msrb.mxu1 %v1807_v41  ;;  %v1775_v24 = vor.u32 %v2197_v13, %v1772_v22 }
  0x8e   : > { %1142 = vmatmul.bf16.gmra.mxu0 %v2775_v36  ;;  %1171 = vmatmul.bf16.gmra.mxu1 %v2777_v37 }
  0x8f   : > { %1200 = vmatmul.bf16.gmra.mxu2 %v2779_v38 }
  0x90   : > { %1229 = vmatmul.bf16.gmra.mxu3 %v2781_v39 }
  0x9e   : > { %1147 = vmatmul.bf16.gmra.mxu0 %v2843_v16  ;;  %1176 = vmatmul.bf16.gmra.mxu1 %v2845_v17 }
  0x9f   : > { %1205 = vmatmul.bf16.gmra.mxu2 %v2847_v18 }
  0xa0   : > { %1234 = vmatmul.bf16.gmra.mxu3 %v2849_v19 }
  0xab   : > { %v1017_v42 = vpop.f32.mrf.mxu0  ;;  %v1046_v43 = vpop.f32.mrf.mxu1 }
  0xac   : > { %v1047_v45 = vadd.f32 %v1046_v43, %v1017_v42  ;;  %v1916_v42 = vld [vmem:[%s3281_s1 + $0x238] sm:$0xf0]  ;;  %v2265_v43 = vld [vmem:[%s3281_s1 + $0x32c] sm:$0xf] }
  0xad   : > { %v1919_v47 = vor.u32 %v2233_v40, %v1916_v42 }
  0xae   : > { %1248 = vmatmul.bf16.vlgmr.msra.gmra.mxu0 %v2564_v48  ;;  %1277 = vmatmul.bf16.vlgmr.msra.gmra.mxu1 %v2575_v53 }
  0xaf   : > { %1306 = vmatmul.bf16.vlgmr.msra.gmra.mxu2 %v2577_v54 }
  0xb0   : > { %1335 = vmatmul.bf16.vlgmr.msra.gmra.mxu3 %v2585_v57  ;;  %1420 = vmatpush.bf16.msrb.mxu2 %v1919_v47 }
  0xb2   : > { %v1075_v0 = vpop.f32.mrf.mxu2 }
  0xb3   : > { %v1076_v2 = vadd.f32 %v1075_v0, %v1047_v45  ;;  %v1104_v3 = vpop.f32.mrf.mxu3  ;;  %v1019_v4 = vpop.f32.mrf.mxu0  ;;  %v2044_v45 = vld [vmem:[%s3281_s1 + $0x338] sm:$0xf0]  ;;  %v1663_v0 = vor.u32 %v2169_v61, %v1660_v62 }
  0xb4   : > { %v1048_v5 = vpop.f32.mrf.mxu1  ;;  %v2047_v49 = vor.u32 %v2265_v43, %v2044_v45 }
  0xb5   : > { %v1105_v6 = vadd.f32 %v1104_v3, %v1076_v2  ;;  %v1049_v14 = vadd.f32 %v1048_v5, %v1019_v4  ;;  %v2229_v2 = vld [vmem:[%s3281_s1 + $0x20c] sm:$0xf]  ;;  %v1791_v3 = vor.u32 %v2201_v63, %v1788_v1  ;;  %v1900_v4 = vld [vmem:[%s3281_s1 + $0x218] sm:$0xf0]  ;;  %1362 = vmatpush.bf16.msrb.mxu0 %v1663_v0 }
  0xb6   : > { %1449 = vmatpush.bf16.msrb.mxu3 %v2047_v49  ;;  %v2261_v5 = vld [vmem:[%s3281_s1 + $0x30c] sm:$0xf]  ;;  %v1903_v8 = vor.u32 %v2229_v2, %v1900_v4 }
  0xb7   : > { %1472 = vst [vmem:[%s3131_s8] sm:$0xff] %v1105_v6  ;;  %v2028_v6 = vld [vmem:[%s3281_s1 + $0x318] sm:$0xf0]  ;;  %1391 = vmatpush.bf16.msrb.mxu1 %v1791_v3 }
  0xb8   : > { %v2031_v9 = vor.u32 %v2261_v5, %v2028_v6  ;;  %1421 = vmatpush.bf16.msrb.mxu2 %v1903_v8 }
  0xb9   : > { %1363 = vmatpush.bf16.msrb.mxu0 %v1647_v21 }
  0xba   : > { %v1077_v23 = vpop.f32.mrf.mxu2  ;;  %1450 = vmatpush.bf16.msrb.mxu3 %v2031_v9 }
  0xbb   : > { %v1078_v25 = vadd.f32 %v1077_v23, %v1049_v14  ;;  %v1106_v26 = vpop.f32.mrf.mxu3  ;;  %v1022_v27 = vpop.f32.mrf.mxu0  ;;  %1392 = vmatpush.bf16.msrb.mxu1 %v1775_v24 }
  0xbc   : > { %v1051_v28 = vpop.f32.mrf.mxu1 }
  0xbd   : > { %v1107_v29 = vadd.f32 %v1106_v26, %v1078_v25  ;;  %v1052_v30 = vadd.f32 %v1051_v28, %v1022_v27 }
  0xbe   : > { %1253 = vmatmul.bf16.gmra.mxu0 %v2680_v44  ;;  %1282 = vmatmul.bf16.gmra.mxu1 %v2691_v50 }
  0xbf   : > { %1476 = vst [vmem:[%s3131_s8 + $0x20] sm:$0xff] %v1107_v29  ;;  %1311 = vmatmul.bf16.gmra.mxu2 %v2693_v51 }
  0xc0   : > { %1340 = vmatmul.bf16.gmra.mxu3 %v2701_v56 }
  0xc2   : > { %v1080_v46 = vpop.f32.mrf.mxu2 }
  0xc3   : > { %v1081_v52 = vadd.f32 %v1080_v46, %v1052_v30  ;;  %v1109_v55 = vpop.f32.mrf.mxu3  ;;  %v1024_v58 = vpop.f32.mrf.mxu0 }
  0xc4   : > { %v1053_v59 = vpop.f32.mrf.mxu1 }
  0xc5   : > { %v1110_v60 = vadd.f32 %v1109_v55, %v1081_v52  ;;  %v1054_v7 = vadd.f32 %v1053_v59, %v1024_v58 }
  0xc7   : > { %1480 = vst [vmem:[%s3131_s8 + $0x40] sm:$0xff] %v1110_v60 }
  0xca   : > { %v1082_v10 = vpop.f32.mrf.mxu2 }
  0xcb   : > { %v1083_v14 = vadd.f32 %v1082_v10, %v1054_v7  ;;  %v1111_v15 = vpop.f32.mrf.mxu3  ;;  %v1027_v20 = vpop.f32.mrf.mxu0 }
  0xcc   : > { %v1056_v23 = vpop.f32.mrf.mxu1 }
  0xcd   : > { %v1112_v25 = vadd.f32 %v1111_v15, %v1083_v14  ;;  %v1057_v26 = vadd.f32 %v1056_v23, %v1027_v20 }
  0xce   : > { %1258 = vmatmul.bf16.gmra.mxu0 %v2775_v36  ;;  %1287 = vmatmul.bf16.gmra.mxu1 %v2777_v37 }
  0xcf   : > { %1484 = vst [vmem:[%s3131_s8 + $0x60] sm:$0xff] %v1112_v25  ;;  %1316 = vmatmul.bf16.gmra.mxu2 %v2779_v38 }
  0xd0   : > { %1345 = vmatmul.bf16.gmra.mxu3 %v2781_v39 }
  0xd2   : > { %v1085_v27 = vpop.f32.mrf.mxu2 }
  0xd3   : > { %v1086_v28 = vadd.f32 %v1085_v27, %v1057_v26  ;;  %v1114_v29 = vpop.f32.mrf.mxu3  ;;  %v1029_v30 = vpop.f32.mrf.mxu0 }
  0xd4   : > { %v1058_v31 = vpop.f32.mrf.mxu1 }
  0xd5   : > { %v1115_v32 = vadd.f32 %v1114_v29, %v1086_v28  ;;  %v1059_v33 = vadd.f32 %v1058_v31, %v1029_v30 }
  0xd7   : > { %1488 = vst [vmem:[%s3131_s8 + $0x80] sm:$0xff] %v1115_v32 }
  0xda   : > { %v1087_v34 = vpop.f32.mrf.mxu2 }
  0xdb   : > { %v1088_v35 = vadd.f32 %v1087_v34, %v1059_v33  ;;  %v1116_v40 = vpop.f32.mrf.mxu3  ;;  %v1032_v41 = vpop.f32.mrf.mxu0 }
  0xdc   : > { %v1061_v42 = vpop.f32.mrf.mxu1 }
  0xdd   : > { %v1117_v43 = vadd.f32 %v1116_v40, %v1088_v35  ;;  %v1062_v45 = vadd.f32 %v1061_v42, %v1032_v41 }
  0xde   : > { %1263 = vmatmul.bf16.gmra.mxu0 %v2843_v16  ;;  %1292 = vmatmul.bf16.gmra.mxu1 %v2845_v17 }
  0xdf   : > { %1492 = vst [vmem:[%s3131_s8 + $0xa0] sm:$0xff] %v1117_v43  ;;  %1321 = vmatmul.bf16.gmra.mxu2 %v2847_v18 }
  0xe0   : > { %1350 = vmatmul.bf16.gmra.mxu3 %v2849_v19 }
  0xe2   : > { %v1090_v46 = vpop.f32.mrf.mxu2 }
  0xe3   : > { %v1091_v47 = vadd.f32 %v1090_v46, %v1062_v45  ;;  %v1119_v49 = vpop.f32.mrf.mxu3  ;;  %v1034_v52 = vpop.f32.mrf.mxu0 }
  0xe4   : > { %v1063_v55 = vpop.f32.mrf.mxu1 }
  0xe5   : > { %v1120_v58 = vadd.f32 %v1119_v49, %v1091_v47  ;;  %v1064_v59 = vadd.f32 %v1063_v55, %v1034_v52 }
  0xe7   : > { %1496 = vst [vmem:[%s3131_s8 + $0xc0] sm:$0xff] %v1120_v58 }
  0xea   : > { %v1092_v60 = vpop.f32.mrf.mxu2 }
  0xeb   : > { %v1093_v61 = vadd.f32 %v1092_v60, %v1064_v59  ;;  %v1121_v62 = vpop.f32.mrf.mxu3  ;;  %v1133_v63 = vpop.f32.mrf.mxu0 }
  0xec   : > { %v1162_v0 = vpop.f32.mrf.mxu1 }
  0xed   : > { %v1122_v1 = vadd.f32 %v1121_v62, %v1093_v61  ;;  %v1163_v2 = vadd.f32 %v1162_v0, %v1133_v63 }
  0xee   : > { %1364 = vmatmul.bf16.vlgmr.msrb.gmra.mxu0 %v2564_v48  ;;  %1393 = vmatmul.bf16.vlgmr.msrb.gmra.mxu1 %v2575_v53 }
  0xef   : > { %1500 = vst [vmem:[%s3131_s8 + $0xe0] sm:$0xff] %v1122_v1  ;;  %1422 = vmatmul.bf16.vlgmr.msrb.gmra.mxu2 %v2577_v54 }
  0xf0   : > { %1451 = vmatmul.bf16.vlgmr.msrb.gmra.mxu3 %v2585_v57 }
  0xf2   : > { %v1191_v3 = vpop.f32.mrf.mxu2 }
  0xf3   : > { %v1192_v4 = vadd.f32 %v1191_v3, %v1163_v2  ;;  %v1220_v5 = vpop.f32.mrf.mxu3  ;;  %v1135_v6 = vpop.f32.mrf.mxu0 }
  0xf4   : > { %v1164_v7 = vpop.f32.mrf.mxu1 }
  0xf5   : > { %v1221_v8 = vadd.f32 %v1220_v5, %v1192_v4  ;;  %v1165_v9 = vadd.f32 %v1164_v7, %v1135_v6 }
  0xf7   : > { %1473 = vst [vmem:[%s3131_s8 + $0x8] sm:$0xff] %v1221_v8 }
  0xfa   : > { %v1193_v10 = vpop.f32.mrf.mxu2 }
  0xfb   : > { %v1194_v11 = vadd.f32 %v1193_v10, %v1165_v9  ;;  %v1222_v48 = vpop.f32.mrf.mxu3  ;;  %v1138_v12 = vpop.f32.mrf.mxu0 }
  0xfc   : > { %v1167_v13 = vpop.f32.mrf.mxu1 }
  0xfd   : > { %v1223_v53 = vadd.f32 %v1222_v48, %v1194_v11  ;;  %v1168_v54 = vadd.f32 %v1167_v13, %v1138_v12 }
  0xfe   : > { %1369 = vmatmul.bf16.gmra.mxu0 %v2680_v44  ;;  %1398 = vmatmul.bf16.gmra.mxu1 %v2691_v50 }
  0xff   : > { %1477 = vst [vmem:[%s3131_s8 + $0x28] sm:$0xff] %v1223_v53  ;;  %1427 = vmatmul.bf16.gmra.mxu2 %v2693_v51 }
 0x100   : > { %1456 = vmatmul.bf16.gmra.mxu3 %v2701_v56 }
 0x102   : > { %v1196_v57 = vpop.f32.mrf.mxu2 }
 0x103   : > { %v1197_v14 = vadd.f32 %v1196_v57, %v1168_v54  ;;  %v1225_v15 = vpop.f32.mrf.mxu3  ;;  %v1140_v20 = vpop.f32.mrf.mxu0 }
 0x104   : > { %v1169_v21 = vpop.f32.mrf.mxu1 }
 0x105   : > { %v1226_v22 = vadd.f32 %v1225_v15, %v1197_v14  ;;  %v1170_v23 = vadd.f32 %v1169_v21, %v1140_v20 }
 0x107   : > { %1481 = vst [vmem:[%s3131_s8 + $0x48] sm:$0xff] %v1226_v22 }
 0x10a   : > { %v1198_v24 = vpop.f32.mrf.mxu2 }
 0x10b   : > { %v1199_v25 = vadd.f32 %v1198_v24, %v1170_v23  ;;  %v1227_v44 = vpop.f32.mrf.mxu3  ;;  %v1143_v26 = vpop.f32.mrf.mxu0 }
 0x10c   : > { %v1172_v27 = vpop.f32.mrf.mxu1 }
 0x10d   : > { %v1228_v50 = vadd.f32 %v1227_v44, %v1199_v25  ;;  %v1173_v51 = vadd.f32 %v1172_v27, %v1143_v26 }
 0x10e   : > { %1374 = vmatmul.bf16.gmra.mxu0 %v2775_v36  ;;  %1403 = vmatmul.bf16.gmra.mxu1 %v2777_v37 }
 0x10f   : > { %1485 = vst [vmem:[%s3131_s8 + $0x68] sm:$0xff] %v1228_v50  ;;  %1432 = vmatmul.bf16.gmra.mxu2 %v2779_v38 }
 0x110   : > { %1461 = vmatmul.bf16.gmra.mxu3 %v2781_v39 }
 0x112   : > { %v1201_v56 = vpop.f32.mrf.mxu2 }
 0x113   : > { %v1202_v28 = vadd.f32 %v1201_v56, %v1173_v51  ;;  %v1230_v29 = vpop.f32.mrf.mxu3  ;;  %v1145_v30 = vpop.f32.mrf.mxu0 }
 0x114   : > { %v1174_v31 = vpop.f32.mrf.mxu1 }
 0x115   : > { %v1231_v32 = vadd.f32 %v1230_v29, %v1202_v28  ;;  %v1175_v33 = vadd.f32 %v1174_v31, %v1145_v30 }
 0x117   : > { %1489 = vst [vmem:[%s3131_s8 + $0x88] sm:$0xff] %v1231_v32 }
 0x11a   : > { %v1203_v34 = vpop.f32.mrf.mxu2 }
 0x11b   : > { %v1204_v35 = vadd.f32 %v1203_v34, %v1175_v33  ;;  %v1232_v36 = vpop.f32.mrf.mxu3  ;;  %v1148_v40 = vpop.f32.mrf.mxu0 }
 0x11c   : > { %v1177_v41 = vpop.f32.mrf.mxu1 }
 0x11d   : > { %v1233_v37 = vadd.f32 %v1232_v36, %v1204_v35  ;;  %v1178_v38 = vadd.f32 %v1177_v41, %v1148_v40 }
 0x11e   : > { %1379 = vmatmul.bf16.gmra.mxu0 %v2843_v16  ;;  %1408 = vmatmul.bf16.gmra.mxu1 %v2845_v17 }
 0x11f   : > { %1493 = vst [vmem:[%s3131_s8 + $0xa8] sm:$0xff] %v1233_v37  ;;  %1437 = vmatmul.bf16.gmra.mxu2 %v2847_v18 }
 0x120   : > { %1466 = vmatmul.bf16.gmra.mxu3 %v2849_v19 }
 0x122   : > { %v1206_v39 = vpop.f32.mrf.mxu2 }
 0x123   : > { %v1207_v42 = vadd.f32 %v1206_v39, %v1178_v38  ;;  %v1235_v43 = vpop.f32.mrf.mxu3  ;;  %v1150_v45 = vpop.f32.mrf.mxu0 }
 0x124   : > { %v1179_v46 = vpop.f32.mrf.mxu1 }
 0x125   : > { %v1236_v47 = vadd.f32 %v1235_v43, %v1207_v42  ;;  %v1180_v49 = vadd.f32 %v1179_v46, %v1150_v45 }
 0x127   : > { %1497 = vst [vmem:[%s3131_s8 + $0xc8] sm:$0xff] %v1236_v47 }
 0x12a   : > { %v1208_v52 = vpop.f32.mrf.mxu2 }
 0x12b   : > { %v1209_v16 = vadd.f32 %v1208_v52, %v1180_v49  ;;  %v1237_v55 = vpop.f32.mrf.mxu3  ;;  %v1249_v58 = vpop.f32.mrf.mxu0 }
 0x12c   : > { %v1278_v59 = vpop.f32.mrf.mxu1 }
 0x12d   : > { %v1238_v17 = vadd.f32 %v1237_v55, %v1209_v16  ;;  %v1279_v18 = vadd.f32 %v1278_v59, %v1249_v58 }
 0x12f   : > { %1501 = vst [vmem:[%s3131_s8 + $0xe8] sm:$0xff] %v1238_v17 }
 0x132   : > { %v1307_v60 = vpop.f32.mrf.mxu2 }
 0x133   : > { %v1308_v19 = vadd.f32 %v1307_v60, %v1279_v18  ;;  %v1336_v61 = vpop.f32.mrf.mxu3  ;;  %v1251_v62 = vpop.f32.mrf.mxu0 }
 0x134   : > { %v1280_v63 = vpop.f32.mrf.mxu1 }
 0x135   : > { %v1337_v0 = vadd.f32 %v1336_v61, %v1308_v19  ;;  %v1281_v1 = vadd.f32 %v1280_v63, %v1251_v62 }
 0x137   : > { %1474 = vst [vmem:[%s3131_s8 + $0x10] sm:$0xff] %v1337_v0 }
 0x13a   : > { %v1309_v2 = vpop.f32.mrf.mxu2 }
 0x13b   : > { %v1310_v3 = vadd.f32 %v1309_v2, %v1281_v1  ;;  %v1338_v4 = vpop.f32.mrf.mxu3  ;;  %v1254_v5 = vpop.f32.mrf.mxu0 }
 0x13c   : > { %v1283_v6 = vpop.f32.mrf.mxu1 }
 0x13d   : > { %v1339_v7 = vadd.f32 %v1338_v4, %v1310_v3  ;;  %v1284_v8 = vadd.f32 %v1283_v6, %v1254_v5 }
 0x13f   : > { %1478 = vst [vmem:[%s3131_s8 + $0x30] sm:$0xff] %v1339_v7 }
 0x142   : > { %v1312_v9 = vpop.f32.mrf.mxu2 }
 0x143   : > { %v1313_v10 = vadd.f32 %v1312_v9, %v1284_v8  ;;  %v1341_v11 = vpop.f32.mrf.mxu3  ;;  %v1256_v48 = vpop.f32.mrf.mxu0 }
 0x144   : > { %v1285_v12 = vpop.f32.mrf.mxu1 }
 0x145   : > { %v1342_v13 = vadd.f32 %v1341_v11, %v1313_v10  ;;  %v1286_v53 = vadd.f32 %v1285_v12, %v1256_v48 }
 0x147   : > { %1482 = vst [vmem:[%s3131_s8 + $0x50] sm:$0xff] %v1342_v13 }
 0x14a   : > { %v1314_v54 = vpop.f32.mrf.mxu2 }
 0x14b   : > { %v1315_v57 = vadd.f32 %v1314_v54, %v1286_v53  ;;  %v1343_v14 = vpop.f32.mrf.mxu3  ;;  %v1259_v15 = vpop.f32.mrf.mxu0 }
 0x14c   : > { %v1288_v20 = vpop.f32.mrf.mxu1 }
 0x14d   : > { %v1344_v21 = vadd.f32 %v1343_v14, %v1315_v57  ;;  %v1289_v22 = vadd.f32 %v1288_v20, %v1259_v15 }
 0x14f   : > { %1486 = vst [vmem:[%s3131_s8 + $0x70] sm:$0xff] %v1344_v21 }
 0x152   : > { %v1317_v23 = vpop.f32.mrf.mxu2 }
 0x153   : > { %v1318_v24 = vadd.f32 %v1317_v23, %v1289_v22  ;;  %v1346_v25 = vpop.f32.mrf.mxu3  ;;  %v1261_v44 = vpop.f32.mrf.mxu0 }
 0x154   : > { %v1290_v26 = vpop.f32.mrf.mxu1 }
 0x155   : > { %v1347_v27 = vadd.f32 %v1346_v25, %v1318_v24  ;;  %v1291_v50 = vadd.f32 %v1290_v26, %v1261_v44 }
 0x157   : > { %1490 = vst [vmem:[%s3131_s8 + $0x90] sm:$0xff] %v1347_v27 }
 0x15a   : > { %v1319_v51 = vpop.f32.mrf.mxu2 }
 0x15b   : > { %v1320_v56 = vadd.f32 %v1319_v51, %v1291_v50  ;;  %v1348_v28 = vpop.f32.mrf.mxu3  ;;  %v1264_v29 = vpop.f32.mrf.mxu0 }
 0x15c   : > { %v1293_v30 = vpop.f32.mrf.mxu1 }
 0x15d   : > { %v1349_v31 = vadd.f32 %v1348_v28, %v1320_v56  ;;  %v1294_v32 = vadd.f32 %v1293_v30, %v1264_v29 }
 0x15f   : > { %1494 = vst [vmem:[%s3131_s8 + $0xb0] sm:$0xff] %v1349_v31 }
 0x162   : > { %v1322_v33 = vpop.f32.mrf.mxu2 }
 0x163   : > { %v1323_v34 = vadd.f32 %v1322_v33, %v1294_v32  ;;  %v1351_v35 = vpop.f32.mrf.mxu3  ;;  %v1266_v36 = vpop.f32.mrf.mxu0 }
 0x164   : > { %v1295_v40 = vpop.f32.mrf.mxu1 }
 0x165   : > { %v1352_v41 = vadd.f32 %v1351_v35, %v1323_v34  ;;  %v1296_v37 = vadd.f32 %v1295_v40, %v1266_v36 }
 0x167   : > { %1498 = vst [vmem:[%s3131_s8 + $0xd0] sm:$0xff] %v1352_v41 }
 0x16a   : > { %v1324_v38 = vpop.f32.mrf.mxu2 }
 0x16b   : > { %v1325_v39 = vadd.f32 %v1324_v38, %v1296_v37  ;;  %v1353_v42 = vpop.f32.mrf.mxu3  ;;  %v1365_v43 = vpop.f32.mrf.mxu0 }
 0x16c   : > { %v1394_v45 = vpop.f32.mrf.mxu1 }
 0x16d   : > { %v1354_v46 = vadd.f32 %v1353_v42, %v1325_v39  ;;  %v1395_v47 = vadd.f32 %v1394_v45, %v1365_v43 }
 0x16f   : > { %1502 = vst [vmem:[%s3131_s8 + $0xf0] sm:$0xff] %v1354_v46 }
 0x172   : > { %v1423_v49 = vpop.f32.mrf.mxu2 }
 0x173   : > { %v1424_v52 = vadd.f32 %v1423_v49, %v1395_v47  ;;  %v1452_v16 = vpop.f32.mrf.mxu3  ;;  %v1367_v55 = vpop.f32.mrf.mxu0 }
 0x174   : > { %v1396_v58 = vpop.f32.mrf.mxu1 }
 0x175   : > { %v1453_v59 = vadd.f32 %v1452_v16, %v1424_v52  ;;  %v1397_v17 = vadd.f32 %v1396_v58, %v1367_v55 }
 0x177   : > { %1475 = vst [vmem:[%s3131_s8 + $0x18] sm:$0xff] %v1453_v59 }
 0x17a   : > { %v1425_v18 = vpop.f32.mrf.mxu2 }
 0x17b   : > { %v1426_v60 = vadd.f32 %v1425_v18, %v1397_v17  ;;  %v1454_v19 = vpop.f32.mrf.mxu3  ;;  %v1370_v61 = vpop.f32.mrf.mxu0 }
 0x17c   : > { %v1399_v62 = vpop.f32.mrf.mxu1 }
 0x17d   : > { %v1455_v63 = vadd.f32 %v1454_v19, %v1426_v60  ;;  %v1400_v0 = vadd.f32 %v1399_v62, %v1370_v61 }
 0x17f   : > { %1479 = vst [vmem:[%s3131_s8 + $0x38] sm:$0xff] %v1455_v63 }
 0x182   : > { %v1428_v1 = vpop.f32.mrf.mxu2 }
 0x183   : > { %v1429_v2 = vadd.f32 %v1428_v1, %v1400_v0  ;;  %v1457_v3 = vpop.f32.mrf.mxu3  ;;  %v1372_v4 = vpop.f32.mrf.mxu0 }
 0x184   : > { %v1401_v5 = vpop.f32.mrf.mxu1 }
 0x185   : > { %v1458_v6 = vadd.f32 %v1457_v3, %v1429_v2  ;;  %v1402_v7 = vadd.f32 %v1401_v5, %v1372_v4 }
 0x187   : > { %1483 = vst [vmem:[%s3131_s8 + $0x58] sm:$0xff] %v1458_v6 }
 0x18a   : > { %v1430_v8 = vpop.f32.mrf.mxu2 }
 0x18b   : > { %v1431_v9 = vadd.f32 %v1430_v8, %v1402_v7  ;;  %v1459_v10 = vpop.f32.mrf.mxu3  ;;  %v1375_v11 = vpop.f32.mrf.mxu0 }
 0x18c   : > { %v1404_v48 = vpop.f32.mrf.mxu1 }
 0x18d   : > { %v1460_v12 = vadd.f32 %v1459_v10, %v1431_v9  ;;  %v1405_v13 = vadd.f32 %v1404_v48, %v1375_v11 }
 0x18f   : > { %1487 = vst [vmem:[%s3131_s8 + $0x78] sm:$0xff] %v1460_v12 }
 0x192   : > { %v1433_v53 = vpop.f32.mrf.mxu2 }
 0x193   : > { %v1434_v54 = vadd.f32 %v1433_v53, %v1405_v13  ;;  %v1462_v57 = vpop.f32.mrf.mxu3  ;;  %v1377_v14 = vpop.f32.mrf.mxu0 }
 0x194   : > { %v1406_v15 = vpop.f32.mrf.mxu1 }
 0x195   : > { %v1463_v20 = vadd.f32 %v1462_v57, %v1434_v54  ;;  %v1407_v21 = vadd.f32 %v1406_v15, %v1377_v14 }
 0x197   : > { %1491 = vst [vmem:[%s3131_s8 + $0x98] sm:$0xff] %v1463_v20 }
 0x19a   : > { %v1435_v22 = vpop.f32.mrf.mxu2 }
 0x19b   : > { %v1436_v23 = vadd.f32 %v1435_v22, %v1407_v21  ;;  %v1464_v24 = vpop.f32.mrf.mxu3  ;;  %v1380_v25 = vpop.f32.mrf.mxu0 }
 0x19c   : > { %v1409_v44 = vpop.f32.mrf.mxu1 }
 0x19d   : > { %v1465_v26 = vadd.f32 %v1464_v24, %v1436_v23  ;;  %v1410_v27 = vadd.f32 %v1409_v44, %v1380_v25 }
 0x19f   : > { %1495 = vst [vmem:[%s3131_s8 + $0xb8] sm:$0xff] %v1465_v26 }
 0x1a2   : > { %v1438_v50 = vpop.f32.mrf.mxu2 }
 0x1a3   : > { %v1439_v51 = vadd.f32 %v1438_v50, %v1410_v27  ;;  %v1467_v56 = vpop.f32.mrf.mxu3  ;;  %v1382_v29 = vpop.f32.mrf.mxu0 }
 0x1a4   : > { %v1411_v30 = vpop.f32.mrf.mxu1 }
 0x1a5   : > { %v1468_v28 = vadd.f32 %v1467_v56, %v1439_v51  ;;  %v1412_v31 = vadd.f32 %v1411_v30, %v1382_v29 }
 0x1a7   : > { %1499 = vst [vmem:[%s3131_s8 + $0xd8] sm:$0xff] %v1468_v28 }
 0x1aa   : > { %v1440_v32 = vpop.f32.mrf.mxu2 }
 0x1ab   : > { %v1441_v33 = vadd.f32 %v1440_v32, %v1412_v31  ;;  %v1469_v34 = vpop.f32.mrf.mxu3 }
 0x1ad   : > { %v1470_v35 = vadd.f32 %v1469_v34, %v1441_v33 }
 0x1af   : > { %1503 = vst [vmem:[%s3131_s8 + $0xf8] sm:$0xff] %v1470_v35 }
 0x1b0 PF: > { %s12_s9 = sadd.s32 1, %s2306_s9  }
 0x1b1   : > { %p9_p4 = scmp.ge.s32.totalorder %s12_s9, 4  }
 0x1b3   :  { %11 = sbr.rel (!%p9_p4) target bundleno = 1 (0x1), region = 58 }

</bundles_post_ra>
